<compile_context>
chip_gen: v7x
topology: tpu7x:2x2x1
jax: 0.10.0
libtpu: 0.0.40
codegen_flags: <defaults>
</compile_context>

<pallas_src>
import functools
from typing import NamedTuple

import numpy as np

import jax
import jax.numpy as jnp
from jax import lax
from jax.experimental import pallas as pl
from jax.experimental.pallas import tpu as pltpu

H_DIMS = [16, 16, 24, 24, 32, 64]
IN_DIM = 2
PATCH = (3, 2)
KSIZE = (5, 2)
DEPTH = 1
FREQ = 192      # fixed by PatchEmbed(192, ...)
C_IN_PAD = 8    # pad the raw 2-channel input to one full sublane group


def _round_up(v, m):
    return (v + m - 1) // m * m


# -------------------- pltpu.roll shift-sign probe (one-time) -----------------
_ROLL_SIGN = None


def _roll_probe_kernel(x_ref, o_ref):
    o_ref[...] = pltpu.roll(x_ref[...], shift=1, axis=1)


def _ensure_roll_sign():
    """Pin down pltpu.roll's shift convention with a tiny one-time probe."""
    global _ROLL_SIGN
    if _ROLL_SIGN is not None:
        return _ROLL_SIGN
    x = jnp.arange(8 * 128, dtype=jnp.float32).reshape(8, 128)
    y = pl.pallas_call(
        _roll_probe_kernel,
        out_shape=jax.ShapeDtypeStruct((8, 128), jnp.float32),
        grid=(1,),
        in_specs=[pl.BlockSpec((8, 128), lambda i: (0, 0))],
        out_specs=pl.BlockSpec((8, 128), lambda i: (0, 0)),
    )(x)
    _ROLL_SIGN = 1 if bool(jnp.all(y == jnp.roll(x, 1, axis=1))) else -1
    return _ROLL_SIGN


# ------------------------------ Pallas kernel --------------------------------
class _ConvCfg(NamedTuple):
    taps: tuple   # ((row_off, col_off), ...) in tap order di*kw + dj (row off dilated)
    H: int        # frequency rows of the (shared) evaluation grid
    W: int        # time columns of the grid
    elu: bool


def _mk_cfg(kh, kw, ph, pw, dil_h, H, W, elu):
    taps = tuple(((di - ph) * dil_h, dj - pw)
                 for di in range(kh) for dj in range(kw))
    return _ConvCfg(taps=taps, H=H, W=W, elu=elu)


def _tap_mask(h_idx, w_idx, roff, coff, H, W, cache):
    """Boundary-validity mask for one tap offset, memoised across layers."""
    key = (roff, coff, H, W)
    if key not in cache:
        conds = []
        if roff > 0:
            conds.append(h_idx < H - roff)
        elif roff < 0:
            conds.append(h_idx >= -roff)
        if coff > 0:
            conds.append(w_idx < W - coff)
        elif coff < 0:
            conds.append(w_idx >= -coff)
        mask = None
        for c in conds:
            mask = c if mask is None else jnp.logical_and(mask, c)
        cache[key] = mask
    return cache[key]


def _conv_taps(x, w_ref, b_ref, h_idx, w_idx, cfg, mask_cache):
    """One conv layer on the flat (C_in, Mp) activation `x` (f32 on bf16 grid).

    Per tap: roll the flat activation by the tap offset, zero the positions
    that would read across a padding / batch boundary, and accumulate a
    (C_out, C_in) x (C_in, Mp) bf16 MXU matmul into an f32 accumulator.
    Returns the (C_out, Mp) activation, rounded to the bf16 grid so chained
    in-kernel layers match a layer-by-layer bf16 reference.
    """
    Mp = x.shape[1]
    sign = _ensure_roll_sign()
    acc = None
    for t, (roff, coff) in enumerate(cfg.taps):
        s = roff * cfg.W + coff               # flat-index offset of this tap
        if s != 0:
            xs = pltpu.roll(x, shift=(sign * (-s)) % Mp, axis=1)
        else:
            xs = x
        mask = _tap_mask(h_idx, w_idx, roff, coff, cfg.H, cfg.W, mask_cache)
        if mask is not None:
            xs = jnp.where(mask, xs, 0.0)
        contrib = jnp.dot(w_ref[t], xs.astype(jnp.bfloat16),
                          preferred_element_type=jnp.float32)
        acc = contrib if acc is None else acc + contrib
    acc = acc + b_ref[...]                    # f32 bias (C_out, 1) broadcast
    if cfg.elu:
        # clamp the expm1 argument so the dead branch can't produce inf/NaN
        acc = jnp.where(acc > 0.0, acc, jnp.expm1(jnp.minimum(acc, 0.0)))
    return acc.astype(jnp.bfloat16).astype(jnp.float32)


def _net_kernel(*refs, cfgs, out_after):
    """One pallas_call = a chain of convs, all resident in VMEM.

    refs = [x, h_idx, w_idx, w0, b0, w1, b1, ..., out0, out1, ...]
    An output ref is written after every layer index listed in `out_after`.
    """
    n_layers = len(cfgs)
    x_ref, h_ref, w_ref = refs[0], refs[1], refs[2]
    wb_refs = refs[3:3 + 2 * n_layers]
    out_refs = refs[3 + 2 * n_layers:]
    h_idx = h_ref[...]
    w_idx = w_ref[...]
    mask_cache = {}
    x = x_ref[...].astype(jnp.float32)
    oi = 0
    for i, cfg in enumerate(cfgs):
        x = _conv_taps(x, wb_refs[2 * i], wb_refs[2 * i + 1],
                       h_idx, w_idx, cfg, mask_cache)
        if i in out_after:
            out_refs[oi][...] = x.astype(jnp.bfloat16)
            oi += 1


def _full_spec(a):
    if a.ndim == 2:
        return pl.BlockSpec(a.shape, lambda i: (0, 0))
    return pl.BlockSpec(a.shape, lambda i: (0, 0, 0))


def _run_net(x_flat, wbs, cfgs, out_after):
    """Run len(wbs) fused conv layers on the flat (C, Mp) activation.

    Emits one lane-dense (C_out_i, Mp) bf16 output per layer index in
    `out_after` (strictly increasing).
    """
    Mp = x_flat.shape[1]
    H, W = cfgs[0].H, cfgs[0].W
    assert all(c.H == H and c.W == W for c in cfgs)
    # Static (trace-time) coordinate maps so the kernel only needs compares.
    m = np.arange(Mp, dtype=np.int32)
    h_idx = jnp.asarray(((m // W) % H).reshape(1, Mp))
    w_idx = jnp.asarray((m % W).reshape(1, Mp))

    args = [x_flat, h_idx, w_idx]
    for w, b in wbs:
        args.extend([w, b])
    in_specs = [_full_spec(a) for a in args]

    out_shape = tuple(jax.ShapeDtypeStruct((wbs[i][0].shape[1], Mp), jnp.bfloat16)
                      for i in out_after)
    out_specs = tuple(pl.BlockSpec(s.shape, lambda i: (0, 0)) for s in out_shape)

    outs = pl.pallas_call(
        functools.partial(_net_kernel, cfgs=tuple(cfgs),
                          out_after=tuple(out_after)),
        out_shape=out_shape,
        grid=(1,),
        in_specs=in_specs,
        out_specs=out_specs,
        compiler_params=pltpu.CompilerParams(
            dimension_semantics=("arbitrary",)),
    )(*args)
    if not isinstance(outs, (tuple, list)):
        outs = (outs,)
    return tuple(outs)


# --------------------------------- params ------------------------------------
def _conv_init(key, c_out, c_in, kh, kw):
    kw_, kb = jax.random.split(key)
    fan_in = c_in * kh * kw
    w = jax.random.normal(kw_, (c_out, c_in, kh, kw), jnp.float32) / jnp.sqrt(fan_in)
    b = 0.01 * jax.random.normal(kb, (c_out,), jnp.float32)
    return w, b


def _prep_conv(w, b, c_in_pad=None):
    """Pre-transpose/pad once at init into the kernel layout (kh*kw, C_out, C_in)."""
    c_out, c_in, kh, kw = w.shape
    wt = jnp.transpose(w, (2, 3, 0, 1)).reshape(kh * kw, c_out, c_in)
    if c_in_pad is not None and c_in_pad > c_in:
        wt = jnp.pad(wt, ((0, 0), (0, 0), (0, c_in_pad - c_in)))
    return wt.astype(jnp.bfloat16), b.reshape(c_out, 1).astype(jnp.float32)


def init_params(key):
    keys = iter(jax.random.split(key, 64))
    params = {
        "patch_embed": _conv_init(next(keys), H_DIMS[0], IN_DIM, *PATCH),
        "pre_conv": _conv_init(next(keys), H_DIMS[0], H_DIMS[0], *KSIZE),
        "blocks": [],
    }
    ins, outs = [H_DIMS[0]] + H_DIMS, H_DIMS
    for i in range(1, len(H_DIMS)):
        params["blocks"].append({
            "down": _conv_init(next(keys), outs[i], ins[i], *KSIZE),
            "convs": [_conv_init(next(keys), outs[i], outs[i], *KSIZE)
                      for _ in range(DEPTH)],
        })
    params["kernel"] = {
        "patch_embed": _prep_conv(*params["patch_embed"], c_in_pad=C_IN_PAD),
        "pre_conv": _prep_conv(*params["pre_conv"]),
        "blocks": [
            {"down": _prep_conv(*blk["down"]),
             "convs": [_prep_conv(*wb) for wb in blk["convs"]]}
            for blk in params["blocks"]
        ],
    }
    return params


# --------------------------------- forward -----------------------------------
def _pad_lanes(y, M):
    Mp = _round_up(M, 128)
    if Mp != M:
        y = jnp.pad(y, ((0, 0), (0, Mp - M)))
    return y


def _forward_impl(params, x):
    kp = params["kernel"]
    B, c_in, H, W = x.shape

    # Module boundary: NCHW f32 -> (C_pad, B*H*W) bf16 flat layout.
    xt = jnp.transpose(x, (1, 0, 2, 3)).reshape(c_in, B * H * W)
    xt = jnp.pad(xt, ((0, C_IN_PAD - c_in), (0, 0))).astype(jnp.bfloat16)
    xt = _pad_lanes(xt, B * H * W)

    # ---- Call 1: PatchEmbed (kernel = stride = patch, no pad/norm/act) ------
    # Computed densely at input resolution; the (3,2) stride is one strided
    # slice in the wrapper.
    cfg = _mk_cfg(PATCH[0], PATCH[1], 0, 0, 1, H, W, elu=False)
    (y,) = _run_net(xt, [kp["patch_embed"]], [cfg], [0])
    cur = y[:, :B * H * W].reshape(-1, B, H, W)[:, :, ::PATCH[0], ::PATCH[1]]
    H, W = H // PATCH[0], W // PATCH[1]
    M = B * H * W

    # ---- Call 2: pre_conv + ALL encoder blocks fused, progressive dilation --
    # Every layer is evaluated at the post-patch (H, W) grid.  Block i's
    # down-conv uses row dilation 2^i, its depth convs 2^(i+1); only rows that
    # are multiples of 2^(i+1) of its output are valid and are the only rows
    # its successors ever read, so garbage never contaminates valid outputs.
    wbs = [kp["pre_conv"]]
    cfgs = [_mk_cfg(KSIZE[0], KSIZE[1], 2, KSIZE[1] - 1, 1, H, W, elu=True)]
    out_after = [0]
    li = 0
    for bi, blk in enumerate(kp["blocks"]):
        d_down = 1 << bi
        d_conv = 1 << (bi + 1)
        wbs.append(blk["down"])
        cfgs.append(_mk_cfg(KSIZE[0], KSIZE[1], 2, KSIZE[1] - 1, d_down, H, W,
                            elu=True))
        li += 1
        for wb in blk["convs"]:
            wbs.append(wb)
            cfgs.append(_mk_cfg(KSIZE[0], KSIZE[1], 2, KSIZE[1] - 1, d_conv, H, W,
                                elu=True))
            li += 1
        out_after.append(li)

    outs = _run_net(_pad_lanes(cur.reshape(-1, M), M), wbs, cfgs, out_after)

    # Module boundary: flat bf16 -> NCHW f32 enc_hs, one strided row slice per
    # block output (stride 2^block).
    enc_hs = []
    for bi, y in enumerate(outs):
        stride = 1 << bi
        yi = y[:, :M].reshape(-1, B, H, W)[:, :, ::stride, :]
        enc_hs.append(jnp.transpose(yi, (1, 0, 2, 3)).astype(jnp.float32))
    return tuple(enc_hs)


_forward_jit = jax.jit(_forward_impl)


def conv_encoder_forward(params, x):
    _ensure_roll_sign()
    enc_hs = list(_forward_jit(params, x))
    return enc_hs, enc_hs[-1].shape[2], enc_hs[-1].shape[3]


# ------------------------------ reference path --------------------------------
def _ref_conv(x, w, b, stride, pad_h, pad_w, elu):
    y = lax.conv_general_dilated(
        x.astype(jnp.bfloat16), w.astype(jnp.bfloat16),
        window_strides=stride, padding=(pad_h, pad_w),
        dimension_numbers=("NCHW", "OIHW", "NCHW"),
        preferred_element_type=jnp.float32)
    y = y + b.reshape(1, -1, 1, 1)
    if elu:
        y = jnp.where(y > 0, y, jnp.expm1(jnp.minimum(y, 0.0)))
    return y.astype(jnp.bfloat16)


def _ref_forward(params, x):
    w, b = params["patch_embed"]
    h = _ref_conv(x, w, b, PATCH, (0, 0), (0, 0), False)
    w, b = params["pre_conv"]
    h = _ref_conv(h, w, b, (1, 1), (2, 2), (1, 0), True)
    enc = [h]
    for blk in params["blocks"]:
        w, b = blk["down"]
        h = _ref_conv(h, w, b, (2, 1), (2, 1), (1, 0), True)
        for w, b in blk["convs"]:
            h = _ref_conv(h, w, b, (1, 1), (2, 2), (1, 0), True)
        enc.append(h)
    return enc


if __name__ == "__main__":
    key = jax.random.PRNGKey(0)
    pkey, xkey = jax.random.split(key)
    params = init_params(pkey)

    B, Wt = 2, 16                      # small time dim; freq fixed at 192
    x = jax.random.normal(xkey, (B, IN_DIM, FREQ, Wt), jnp.float32)

    enc_hs, Hf, Wf = conv_encoder_forward(params, x)
    jax.block_until_ready(enc_hs)

    # numerical check against an XLA conv chain with identical bf16/f32 casts
    ref = _ref_forward(params, x)
    for got, want in zip(enc_hs, ref):
        assert got.shape == want.shape, (got.shape, want.shape)
        assert jnp.allclose(got, want.astype(jnp.float32), atol=5e-2, rtol=5e-2)

    expected = [(B, 16, 64, 8), (B, 16, 32, 8), (B, 24, 16, 8),
                (B, 24, 8, 8), (B, 32, 4, 8), (B, 64, 2, 8)]
    assert [tuple(h.shape) for h in enc_hs] == expected
    assert (Hf, Wf) == (2, 8)
    print("KERNEL_OK")
</pallas_src>

<mosaic_0001>
module attributes {stable_mosaic.version = 11 : i64} {
  func.func @_roll_probe_kernel(%arg0: i32, %arg1: memref<8x128xf32, #tpu.memory_space<vmem>>, %arg2: memref<8x128xf32, #tpu.memory_space<vmem>>) attributes {dimension_semantics = [#tpu.dimension_semantics<arbitrary>], iteration_bounds = array<i64: 1>, scalar_prefetch = 0 : i64, scratch_operands = 0 : i64, tpu.core_type = #tpu.core_type<tc>, window_params = [{pipeline_mode = #tpu.pipeline_mode<synchronous>, transform_indices = @transform_0, window_bounds = array<i64: 8, 128>}, {pipeline_mode = #tpu.pipeline_mode<synchronous>, transform_indices = @transform_1, window_bounds = array<i64: 8, 128>}]} {
    %c0 = arith.constant 0 : index
    %c0_0 = arith.constant 0 : index
    %0 = vector.load %arg1[%c0, %c0_0] : memref<8x128xf32, #tpu.memory_space<vmem>>, vector<8x128xf32>
    %c1_i32 = arith.constant 1 : i32
    %1 = tpu.dynamic_rotate %0 by %c1_i32 dim 1 : vector<8x128xf32>, i32 -> vector<8x128xf32>
    %c0_1 = arith.constant 0 : index
    %c0_2 = arith.constant 0 : index
    %2 = vector.load %arg2[%c0_1, %c0_2] : memref<8x128xf32, #tpu.memory_space<vmem>>, vector<8x128xf32>
    tpu.vector_store %arg2[%c0_1, %c0_2], %1 {strides = array<i32>} : memref<8x128xf32, #tpu.memory_space<vmem>>, vector<8x128xf32>,
    return
  }
  func.func @transform_0(%arg0: i32) -> (i32, i32) {
    %c0_i32 = arith.constant 0 : i32
    %c0_i32_0 = arith.constant 0 : i32
    %c0_i32_1 = arith.constant 0 : i32
    return %c0_i32, %c0_i32_0 : i32, i32
  }
  func.func @transform_1(%arg0: i32) -> (i32, i32) {
    %c0_i32 = arith.constant 0 : i32
    %c0_i32_0 = arith.constant 0 : i32
    %c0_i32_1 = arith.constant 0 : i32
    return %c0_i32, %c0_i32_0 : i32, i32
  }
}

</mosaic_0001>

<bundles_post_ra>
// kernel: tpu_custom_call.1
= control target key start
LH: loop header
LB: loop body
LE: loop exit
PB: predicated region body
PF: predicated region fallthrough
CT: control target
= control target key end

     0   :  { %6 = vsyncpa [#allocation3], 0  ;;  %s128_s0 = inlined_call_operand.hbm [shape: f32[8,128], index: 0, kind: input, shape index: {}]   ;;  %s129_s1 = inlined_call_operand.hbm [shape: f32[8,128], index: 1, kind: output, shape index: {}]  }
   0x1   :  { %7 = vsyncpa [#allocation4], 0  ;;  %s91_s6 = smov [#allocation2]   ;;  %s43_s10 = scalar_lea.hbm %s128_s0, 128 }
   0x2   :  { %s14_s7 = sshll.u32 %s91_s6, 4  ;;  %p44_p0 = scmp.ne.s32.totalorder %s128_s0, %s43_s10  ;;  %s15_s7 = int_to_ptr.vmem [resolvable:$true] %s14_s7 }
   0x3   :  { %p47_p1 = scmp.lt.u32.totalorder %s43_s10, %s128_s0 }
   0x5   :  { %p49_p2 = pnand %p47_p1, %p44_p0 }
   0x7   :  { %52 = shalt.err (!%p49_p2)
}
   0x8   :  { %s53_s15 = scalar_lea.vmem %s15_s7, 128  ;;  %p58_p4 = scmp.lt.s32.totalorder %s15_s7, %s15_s7 }
   0x9   :  { %p54_p3 = scmp.ne.s32.totalorder %s15_s7, %s53_s15  ;;  %p59_p5 = scmp.lt.s32.totalorder %s53_s15, %s53_s15 }
   0xb   :  { %p60_p6 = por %p59_p5, %p58_p4 }
   0xd   :  { %p61_p7 = pnand %p60_p6, %p54_p3 }
   0xf   :  { %64 = shalt.err (!%p61_p7)
}
  0x10   :  { %17 = dma.hbm_to_vmem [thread:$0]  %s128_s0, 128, %s15_s7, [#allocation3]  }
  0x11   :  { %87 = dma.done.wait [#allocation3], 128  }
  0x12   :  { %88 = vsyncadd [#allocation3], 4294967168  ;;  %v21_v0 = vld [vmem:[#allocation2] sm:$0xff]  ;;  %s92_s18 = smov 1   ;;  %s93_s19 = smov [#allocation5]  }
  0x13   :  { %22 = vrot.lane.b32.xlu0 %v21_v0, %s92_s18  ;;  %s31_s20 = sshll.u32 %s93_s19, 4  ;;  %s32_s20 = int_to_ptr.vmem [resolvable:$true] %s31_s20 }
  0x14   :  { %s65_s21 = scalar_lea.vmem %s32_s20, 128  ;;  %p70_p9 = scmp.lt.s32.totalorder %s32_s20, %s32_s20 }
  0x15   :  { %p66_p8 = scmp.ne.s32.totalorder %s32_s20, %s65_s21  ;;  %p71_p10 = scmp.lt.s32.totalorder %s65_s21, %s65_s21 }
  0x17   :  { %p72_p11 = por %p71_p10, %p70_p9 }
  0x19   :  { %p73_p12 = pnand %p72_p11, %p66_p8 }
  0x85   :  { %v23_v1 = vpop.permute.xlu0 %22 }
  0x86   :  { %24 = vst [vmem:[#allocation5] sm:$0xff] %v23_v1 }
  0x87   :  { %76 = shalt.err (!%p73_p12)
}
  0x88   :  { %s77_s0 = scalar_lea.hbm %s129_s1, 128 }
  0x89   :  { %p78_p13 = scmp.ne.s32.totalorder %s129_s1, %s77_s0  ;;  %p81_p0 = scmp.lt.u32.totalorder %s77_s0, %s129_s1 }
  0x8b   :  { %p83_p1 = pnand %p81_p0, %p78_p13 }
  0x8d   :  { %86 = shalt.err (!%p83_p1)
}
  0x8e   :  { %34 = dma.vmem_to_hbm [thread:$0]  %s32_s20, 128, %s129_s1, [#allocation4]  }
  0x8f   :  { %89 = dma.done.wait [#allocation4], 128  }
  0x90   :  { %90 = vsyncadd [#allocation4], 4294967168 }
  0x91   :  { %38 = vsyncpa [#allocation3], 1 }
  0x92   :  { %39 = vsyncpa [#allocation4], 1 }

</bundles_post_ra>
